<compile_context>
chip_gen: v7x
topology: tpu7x:2x2x1
jax: 0.10.0
libtpu: 0.0.40
codegen_flags: <defaults>
</compile_context>

<pallas_src>
import functools
import math

import jax
import jax.numpy as jnp
from jax import lax
from jax.experimental import pallas as pl
from jax.experimental.pallas import tpu as pltpu


# ---------------------------------------------------------------------------
# Fused per-(batch, head) attention kernel
# ---------------------------------------------------------------------------

def _attn_head_kernel(x_q_ref, x_k_ref, x_v_ref,
                      wq_ref, bq_ref, wk_ref, bk_ref,
                      wv_ref, bv_ref, wo_ref, bo_ref,
                      out_ref, *rest,
                      compute_dtype, with_att):
    if with_att:
        att_ref, acc_ref = rest
    else:
        (acc_ref,) = rest

    hh = pl.program_id(1)                       # head index (innermost axis)
    cd = jnp.dtype(compute_dtype)
    use_approx = cd != jnp.dtype(jnp.float32)

    # Initialize the per-batch output accumulator with the output bias.
    @pl.when(hh == 0)
    def _init():
        acc_ref[...] = jnp.broadcast_to(
            bo_ref[...].astype(jnp.float32), acc_ref.shape)

    x_q = x_q_ref[0]                            # (nq, d_model), compute dtype
    x_k = x_k_ref[0]                            # (nk, d_model)
    x_v = x_v_ref[0]                            # (nk, d_model)

    wq = wq_ref[0]                              # (d_model, d_k)  (scale folded)
    wk = wk_ref[0]                              # (d_model, d_k)
    wv = wv_ref[0]                              # (d_model, d_v)
    wo = wo_ref[0]                              # (d_v, d_model)
    bq = bq_ref[0]                              # (1, d_k) fp32   (scale folded)
    bk = bk_ref[0]                              # (1, d_k) fp32
    bv = bv_ref[0]                              # (1, d_v) fp32

    # Per-head projections: MXU matmuls with fp32 accumulation.
    q = (jnp.dot(x_q, wq, preferred_element_type=jnp.float32) + bq).astype(cd)
    k = (jnp.dot(x_k, wk, preferred_element_type=jnp.float32) + bk).astype(cd)
    v = (jnp.dot(x_v, wv, preferred_element_type=jnp.float32) + bv).astype(cd)

    # scores = q @ k^T via dot_general contracting the last axes (no .T).
    s = lax.dot_general(q, k, (((1,), (1,)), ((), ())),
                        preferred_element_type=jnp.float32)        # (nq, nk)

    # Numerically stable softmax over keys; stats stay fp32.
    m = jnp.max(s, axis=-1, keepdims=True)
    p = jnp.exp(s - m)
    l = jnp.sum(p, axis=-1, keepdims=True)
    # EUP reciprocal in the low-precision path; exact divide in fp32 mode.
    p = p * pl.reciprocal(l, approx=use_approx)

    if with_att:
        att_ref[0, 0] = p.astype(att_ref.dtype)

    # This head's contribution to the output projection, accumulated in fp32.
    head_out = jnp.dot(p.astype(cd), v, preferred_element_type=jnp.float32)
    acc_ref[...] += jnp.dot(head_out.astype(cd), wo,
                            preferred_element_type=jnp.float32)

    @pl.when(hh == pl.num_programs(1) - 1)
    def _store():
        out_ref[0] = acc_ref[...].astype(out_ref.dtype)


# ---------------------------------------------------------------------------
# Wrapper
# ---------------------------------------------------------------------------

def _pick_vmem_limit(est_bytes):
    """Derive a scoped-VMEM limit from the actual resident block sizes."""
    try:
        info = pltpu.get_tpu_info()
        cap = int(getattr(info, "vmem_capacity_bytes", 0)) or (64 << 20)
    except Exception:  # pragma: no cover - conservative fallback
        cap = 64 << 20
    limit = max(int(1.5 * est_bytes), 32 << 20)
    return min(limit, int(0.75 * cap), 100 << 20)


def attention_forward(queries, keys, values, kernel_params, *, h, d_k, d_v,
                      compute_dtype=jnp.bfloat16, return_att=True,
                      att_dtype=None):
    """queries (b,nq,d_model), keys/values (b,nk,d_model) -> (out, att|None).

    kernel_params are already in head-major kernel layout with 1/sqrt(d_k)
    folded into Wq/bq and weights pre-cast to compute_dtype.
    """
    b_s, nq, d_model = queries.shape
    nk = keys.shape[1]
    cd = jnp.dtype(compute_dtype)
    wq, bq, wk, bk, wv, bv, wo, bo = kernel_params

    if att_dtype is None:
        att_dtype = jnp.float32 if cd == jnp.dtype(jnp.float32) else jnp.bfloat16
    att_dtype = jnp.dtype(att_dtype)
    out_dtype = queries.dtype

    # Feed activations to the kernel in the compute dtype (halves input DMA
    # and input VMEM in bf16 mode). Ideally callers pass bf16 natively.
    x_q = queries.astype(cd)
    x_k = keys.astype(cd)
    x_v = values.astype(cd)

    kernel = functools.partial(_attn_head_kernel,
                               compute_dtype=cd, with_att=return_att)

    in_specs = [
        pl.BlockSpec((1, nq, d_model), lambda b, hh: (b, 0, 0)),    # x_q
        pl.BlockSpec((1, nk, d_model), lambda b, hh: (b, 0, 0)),    # x_k
        pl.BlockSpec((1, nk, d_model), lambda b, hh: (b, 0, 0)),    # x_v
        pl.BlockSpec((1, d_model, d_k), lambda b, hh: (hh, 0, 0)),  # Wq[h]
        pl.BlockSpec((1, 1, d_k), lambda b, hh: (hh, 0, 0)),        # bq[h]
        pl.BlockSpec((1, d_model, d_k), lambda b, hh: (hh, 0, 0)),  # Wk[h]
        pl.BlockSpec((1, 1, d_k), lambda b, hh: (hh, 0, 0)),        # bk[h]
        pl.BlockSpec((1, d_model, d_v), lambda b, hh: (hh, 0, 0)),  # Wv[h]
        pl.BlockSpec((1, 1, d_v), lambda b, hh: (hh, 0, 0)),        # bv[h]
        pl.BlockSpec((1, d_v, d_model), lambda b, hh: (hh, 0, 0)),  # Wo[h]
        pl.BlockSpec((1, d_model), lambda b, hh: (0, 0)),           # bo
    ]
    out_shapes = [jax.ShapeDtypeStruct((b_s, nq, d_model), out_dtype)]
    out_specs = [pl.BlockSpec((1, nq, d_model), lambda b, hh: (b, 0, 0))]
    if return_att:
        out_shapes.append(jax.ShapeDtypeStruct((b_s, h, nq, nk), att_dtype))
        out_specs.append(pl.BlockSpec((1, 1, nq, nk),
                                      lambda b, hh: (b, hh, 0, 0)))

    act_b = cd.itemsize
    out_b = jnp.dtype(out_dtype).itemsize
    att_b = att_dtype.itemsize if return_att else 0
    w_b = cd.itemsize

    flops = (2 * b_s * nq * d_model * h * d_k          # q projection
             + 2 * b_s * nk * d_model * h * d_k        # k projection
             + 2 * b_s * nk * d_model * h * d_v        # v projection
             + 2 * b_s * h * nq * nk * (d_k + d_v)     # QK^T and PV
             + 2 * b_s * nq * h * d_v * d_model)       # output projection
    bytes_accessed = (
        act_b * b_s * (nq + 2 * nk) * d_model          # activations in
        + out_b * b_s * nq * d_model                   # out
        + att_b * b_s * h * nq * nk                    # att (optional)
        + w_b * b_s * h * (d_model * (2 * d_k + d_v) + d_v * d_model)  # weights
        + 4 * b_s * h * (2 * d_k + d_v + d_model))     # biases (fp32)

    # Per-step VMEM estimate (double-buffered blocks + scratch + intermediates).
    vmem_est = (
        2 * (nq + 2 * nk) * d_model * act_b                            # x blocks
        + 2 * (d_model * (2 * d_k + d_v) + d_v * d_model) * w_b        # W blocks
        + 2 * (2 * d_k + d_v + d_model) * 4                            # biases
        + 2 * nq * d_model * out_b                                     # out block
        + (2 * nq * nk * att_b if return_att else 0)                   # att block
        + nq * d_model * 4                                             # acc scratch
        + 2 * nq * nk * 4 + (nq + nk) * d_k * 4 + (nq + nk) * d_v * 4) # live temps

    results = pl.pallas_call(
        kernel,
        out_shape=tuple(out_shapes),
        grid=(b_s, h),
        in_specs=in_specs,
        out_specs=tuple(out_specs),
        scratch_shapes=[pltpu.VMEM((nq, d_model), jnp.float32)],
        compiler_params=pltpu.CompilerParams(
            # batch axis shards across TensorCores; head axis is the output
            # reduction (accumulator) axis.
            dimension_semantics=("parallel", "arbitrary"),
            vmem_limit_bytes=_pick_vmem_limit(vmem_est),
        ),
        cost_estimate=pl.CostEstimate(
            flops=int(flops),
            transcendentals=int(b_s * h * nq * nk),
            bytes_accessed=int(bytes_accessed),
        ),
    )(x_q, x_k, x_v, wq, bq, wk, bk, wv, bv, wo, bo)

    if return_att:
        out, att = results
        return out, att
    (out,) = results
    return out, None


# ---------------------------------------------------------------------------
# Module wrapper (parameter setup only; all math lives in the kernel)
# ---------------------------------------------------------------------------

def xavier_uniform(key, fan_in, fan_out, dtype=jnp.float32):
    limit = math.sqrt(6.0 / (fan_in + fan_out))
    # stored as (d_in, d_out) == transpose of torch's (out, in) weight
    return jax.random.uniform(
        key, (fan_in, fan_out), minval=-limit, maxval=limit, dtype=dtype)


class ScaledDotProductAttention:
    def __init__(self, *, d_model, d_k, d_v, h, key,
                 compute_dtype=jnp.bfloat16):
        self.d_model, self.d_k, self.d_v, self.h = d_model, d_k, d_v, h
        self.compute_dtype = compute_dtype
        kq, kk, kv, ko = jax.random.split(key, 4)
        # Reference (torch-equivalent) 2-D parameters, fp32.
        self.Wq = xavier_uniform(kq, d_model, h * d_k)
        self.Wk = xavier_uniform(kk, d_model, h * d_k)
        self.Wv = xavier_uniform(kv, d_model, h * d_v)
        self.Wo = xavier_uniform(ko, h * d_v, d_model)
        self.bq = jnp.zeros((1, h * d_k), jnp.float32)
        self.bk = jnp.zeros((1, h * d_k), jnp.float32)
        self.bv = jnp.zeros((1, h * d_v), jnp.float32)
        self.bo = jnp.zeros((1, d_model), jnp.float32)
        self._param_cache = {}

    def refresh_params(self):
        """Call after mutating weights/biases to rebuild kernel-layout cache."""
        self._param_cache = {}

    def _kernel_params(self, compute_dtype):
        cd = jnp.dtype(compute_dtype)
        cache_key = cd.name
        if cache_key not in self._param_cache:
            h, d_model, d_k, d_v = self.h, self.d_model, self.d_k, self.d_v
            scale = 1.0 / math.sqrt(d_k)
            # Head-major 3-D layouts for BlockSpec head slicing; 1/sqrt(d_k)
            # folded into Wq/bq; weights pre-cast to the compute dtype; biases
            # stay fp32 (added after the fp32 accumulate).
            wq = ((self.Wq * scale).reshape(d_model, h, d_k)
                  .transpose(1, 0, 2).astype(cd))
            wk = self.Wk.reshape(d_model, h, d_k).transpose(1, 0, 2).astype(cd)
            wv = self.Wv.reshape(d_model, h, d_v).transpose(1, 0, 2).astype(cd)
            wo = self.Wo.reshape(h, d_v, d_model).astype(cd)
            bq = (self.bq * scale).reshape(h, 1, d_k)
            bk = self.bk.reshape(h, 1, d_k)
            bv = self.bv.reshape(h, 1, d_v)
            bo = self.bo
            self._param_cache[cache_key] = (wq, bq, wk, bk, wv, bv, wo, bo)
        return self._param_cache[cache_key]

    def __call__(self, queries, keys, values, attention_mask=None, *,
                 attention_weights=None, history_states=None,
                 compute_dtype=None, return_att=True, att_dtype=None):
        # TODO(synk): attention_mask / attention_weights paths are not
        # implemented (None path only).
        assert attention_mask is None and attention_weights is None
        if history_states is not None:
            keys = history_states
            values = history_states
        cd = self.compute_dtype if compute_dtype is None else compute_dtype
        params = self._kernel_params(cd)
        return attention_forward(queries, keys, values, params,
                                 h=self.h, d_k=self.d_k, d_v=self.d_v,
                                 compute_dtype=cd, return_att=return_att,
                                 att_dtype=att_dtype)


# ---------------------------------------------------------------------------
# Pure-JAX fp32 reference for correctness checking
# ---------------------------------------------------------------------------

def reference_forward(mod, queries, keys, values):
    b_s, nq, _ = queries.shape
    nk = keys.shape[1]
    h, d_k, d_v = mod.h, mod.d_k, mod.d_v
    q = (queries @ mod.Wq + mod.bq).reshape(b_s, nq, h, d_k).transpose(0, 2, 1, 3)
    k = (keys @ mod.Wk + mod.bk).reshape(b_s, nk, h, d_k).transpose(0, 2, 3, 1)
    v = (values @ mod.Wv + mod.bv).reshape(b_s, nk, h, d_v).transpose(0, 2, 1, 3)
    att = jnp.matmul(q, k) / math.sqrt(d_k)
    att = jax.nn.softmax(att, axis=-1)
    out = jnp.matmul(att, v).transpose(0, 2, 1, 3).reshape(b_s, nq, h * d_v)
    out = out @ mod.Wo + mod.bo
    return out, att


# ---------------------------------------------------------------------------

if __name__ == "__main__":
    key = jax.random.PRNGKey(0)
    kp, kq, kk, kv, kb = jax.random.split(key, 5)

    b_s, nq, nk = 2, 8, 8
    d_model, d_k, d_v, h = 32, 8, 8, 4

    mod = ScaledDotProductAttention(d_model=d_model, d_k=d_k, d_v=d_v, h=h,
                                    key=kp)
    # Exercise the bias path with nonzero values.
    kb1, kb2, kb3, kb4 = jax.random.split(kb, 4)
    mod.bq = 0.1 * jax.random.normal(kb1, (1, h * d_k), jnp.float32)
    mod.bk = 0.1 * jax.random.normal(kb2, (1, h * d_k), jnp.float32)
    mod.bv = 0.1 * jax.random.normal(kb3, (1, h * d_v), jnp.float32)
    mod.bo = 0.1 * jax.random.normal(kb4, (1, d_model), jnp.float32)
    mod.refresh_params()

    queries = jax.random.normal(kq, (b_s, nq, d_model), jnp.float32)
    keys = jax.random.normal(kk, (b_s, nk, d_model), jnp.float32)
    values = jax.random.normal(kv, (b_s, nk, d_model), jnp.float32)

    out_ref, att_ref = reference_forward(mod, queries, keys, values)

    # Exact fp32 path (structure check, tight tolerance).
    out32, att32 = mod(queries, keys, values, compute_dtype=jnp.float32)
    jax.block_until_ready(out32)
    jax.block_until_ready(att32)
    assert out32.shape == (b_s, nq, d_model)
    assert att32.shape == (b_s, h, nq, nk)
    assert jnp.allclose(out32, out_ref, atol=1e-4, rtol=1e-4)
    assert jnp.allclose(att32, att_ref, atol=1e-4, rtol=1e-4)

    # Default bf16-MXU path (fp32 accumulation, bf16 att) -- looser tolerance.
    out, att = mod(queries, keys, values)
    jax.block_until_ready(out)
    jax.block_until_ready(att)
    assert att.dtype == jnp.bfloat16
    assert jnp.allclose(out, out_ref, atol=5e-2, rtol=5e-2)
    assert jnp.allclose(att.astype(jnp.float32), att_ref, atol=2e-2, rtol=5e-2)

    # att-free path (skips the (b,h,nq,nk) HBM store entirely).
    out_na, att_na = mod(queries, keys, values, return_att=False)
    jax.block_until_ready(out_na)
    assert att_na is None
    assert jnp.allclose(out_na, out_ref, atol=5e-2, rtol=5e-2)

    # history_states path (keys/values come from history_states).
    out_hs, _ = mod(queries, None, None, history_states=keys,
                    compute_dtype=jnp.float32)
    out_hs_ref, _ = reference_forward(mod, queries, keys, keys)
    jax.block_until_ready(out_hs)
    assert jnp.allclose(out_hs, out_hs_ref, atol=1e-4, rtol=1e-4)

    print("KERNEL_OK")
</pallas_src>

<mosaic_0001>
module attributes {stable_mosaic.version = 11 : i64} {
  func.func @_attn_head_kernel(%arg0: i32, %arg1: i32, %arg2: memref<1x8x32xf32, #tpu.memory_space<vmem>>, %arg3: memref<1x8x32xf32, #tpu.memory_space<vmem>>, %arg4: memref<1x8x32xf32, #tpu.memory_space<vmem>>, %arg5: memref<1x32x8xf32, #tpu.memory_space<vmem>>, %arg6: memref<1x1x8xf32, #tpu.memory_space<vmem>>, %arg7: memref<1x32x8xf32, #tpu.memory_space<vmem>>, %arg8: memref<1x1x8xf32, #tpu.memory_space<vmem>>, %arg9: memref<1x32x8xf32, #tpu.memory_space<vmem>>, %arg10: memref<1x1x8xf32, #tpu.memory_space<vmem>>, %arg11: memref<1x8x32xf32, #tpu.memory_space<vmem>>, %arg12: memref<1x32xf32, #tpu.memory_space<vmem>>, %arg13: memref<1x8x32xf32, #tpu.memory_space<vmem>>, %arg14: memref<1x1x8x8xf32, #tpu.memory_space<vmem>>, %arg15: memref<8x32xf32, #tpu.memory_space<vmem>>) attributes {dimension_semantics = [#tpu.dimension_semantics<parallel>, #tpu.dimension_semantics<arbitrary>], iteration_bounds = array<i64: 2, 4>, scalar_prefetch = 0 : i64, scratch_operands = 1 : i64, tpu.core_type = #tpu.core_type<tc>, window_params = [{transform_indices = @transform_0, window_bounds = array<i64: 1, 8, 32>}, {transform_indices = @transform_1, window_bounds = array<i64: 1, 8, 32>}, {transform_indices = @transform_2, window_bounds = array<i64: 1, 8, 32>}, {transform_indices = @transform_3, window_bounds = array<i64: 1, 32, 8>}, {transform_indices = @transform_4, window_bounds = array<i64: 1, 1, 8>}, {transform_indices = @transform_5, window_bounds = array<i64: 1, 32, 8>}, {transform_indices = @transform_6, window_bounds = array<i64: 1, 1, 8>}, {transform_indices = @transform_7, window_bounds = array<i64: 1, 32, 8>}, {transform_indices = @transform_8, window_bounds = array<i64: 1, 1, 8>}, {transform_indices = @transform_9, window_bounds = array<i64: 1, 8, 32>}, {pipeline_mode = #tpu.pipeline_mode<synchronous>, transform_indices = @transform_10, window_bounds = array<i64: 1, 32>}, {transform_indices = @transform_11, window_bounds = array<i64: 1, 8, 32>}, {transform_indices = @transform_12, window_bounds = array<i64: 1, 1, 8, 8>}]} {
    %c0_i32 = arith.constant 0 : i32
    %0 = arith.cmpi eq, %arg1, %c0_i32 : i32
    %1 = arith.extui %0 : i1 to i32
    %c0_i32_0 = arith.constant 0 : i32
    %2 = arith.cmpi ne, %1, %c0_i32_0 : i32
    scf.if %2 {
      %c0_46 = arith.constant 0 : index
      %c0_47 = arith.constant 0 : index
      %54 = vector.load %arg12[%c0_46, %c0_47] : memref<1x32xf32, #tpu.memory_space<vmem>>, vector<1x32xf32>
      %55 = vector.shape_cast %54 : vector<1x32xf32> to vector<1x32xf32>
      %56 = vector.broadcast %55 : vector<1x32xf32> to vector<8x32xf32>
      %c0_48 = arith.constant 0 : index
      %c0_49 = arith.constant 0 : index
      %57 = vector.load %arg15[%c0_48, %c0_49] : memref<8x32xf32, #tpu.memory_space<vmem>>, vector<8x32xf32>
      tpu.vector_store %arg15[%c0_48, %c0_49], %56 {strides = array<i32>} : memref<8x32xf32, #tpu.memory_space<vmem>>, vector<8x32xf32>,
    } else {
    }
    %c0 = arith.constant 0 : index
    %c0_1 = arith.constant 0 : index
    %c0_2 = arith.constant 0 : index
    %3 = vector.load %arg2[%c0, %c0_1, %c0_2] : memref<1x8x32xf32, #tpu.memory_space<vmem>>, vector<1x8x32xf32>
    %4 = vector.shape_cast %3 : vector<1x8x32xf32> to vector<8x32xf32>
    %c0_3 = arith.constant 0 : index
    %c0_4 = arith.constant 0 : index
    %c0_5 = arith.constant 0 : index
    %5 = vector.load %arg3[%c0_3, %c0_4, %c0_5] : memref<1x8x32xf32, #tpu.memory_space<vmem>>, vector<1x8x32xf32>
    %6 = vector.shape_cast %5 : vector<1x8x32xf32> to vector<8x32xf32>
    %c0_6 = arith.constant 0 : index
    %c0_7 = arith.constant 0 : index
    %c0_8 = arith.constant 0 : index
    %7 = vector.load %arg4[%c0_6, %c0_7, %c0_8] : memref<1x8x32xf32, #tpu.memory_space<vmem>>, vector<1x8x32xf32>
    %8 = vector.shape_cast %7 : vector<1x8x32xf32> to vector<8x32xf32>
    %c0_9 = arith.constant 0 : index
    %c0_10 = arith.constant 0 : index
    %c0_11 = arith.constant 0 : index
    %9 = vector.load %arg5[%c0_9, %c0_10, %c0_11] : memref<1x32x8xf32, #tpu.memory_space<vmem>>, vector<1x32x8xf32>
    %10 = vector.shape_cast %9 : vector<1x32x8xf32> to vector<32x8xf32>
    %c0_12 = arith.constant 0 : index
    %c0_13 = arith.constant 0 : index
    %c0_14 = arith.constant 0 : index
    %11 = vector.load %arg7[%c0_12, %c0_13, %c0_14] : memref<1x32x8xf32, #tpu.memory_space<vmem>>, vector<1x32x8xf32>
    %12 = vector.shape_cast %11 : vector<1x32x8xf32> to vector<32x8xf32>
    %c0_15 = arith.constant 0 : index
    %c0_16 = arith.constant 0 : index
    %c0_17 = arith.constant 0 : index
    %13 = vector.load %arg9[%c0_15, %c0_16, %c0_17] : memref<1x32x8xf32, #tpu.memory_space<vmem>>, vector<1x32x8xf32>
    %14 = vector.shape_cast %13 : vector<1x32x8xf32> to vector<32x8xf32>
    %c0_18 = arith.constant 0 : index
    %c0_19 = arith.constant 0 : index
    %c0_20 = arith.constant 0 : index
    %15 = vector.load %arg11[%c0_18, %c0_19, %c0_20] : memref<1x8x32xf32, #tpu.memory_space<vmem>>, vector<1x8x32xf32>
    %16 = vector.shape_cast %15 : vector<1x8x32xf32> to vector<8x32xf32>
    %c0_21 = arith.constant 0 : index
    %c0_22 = arith.constant 0 : index
    %c0_23 = arith.constant 0 : index
    %17 = vector.load %arg6[%c0_21, %c0_22, %c0_23] : memref<1x1x8xf32, #tpu.memory_space<vmem>>, vector<1x1x8xf32>
    %18 = vector.shape_cast %17 : vector<1x1x8xf32> to vector<1x8xf32>
    %c0_24 = arith.constant 0 : index
    %c0_25 = arith.constant 0 : index
    %c0_26 = arith.constant 0 : index
    %19 = vector.load %arg8[%c0_24, %c0_25, %c0_26] : memref<1x1x8xf32, #tpu.memory_space<vmem>>, vector<1x1x8xf32>
    %20 = vector.shape_cast %19 : vector<1x1x8xf32> to vector<1x8xf32>
    %c0_27 = arith.constant 0 : index
    %c0_28 = arith.constant 0 : index
    %c0_29 = arith.constant 0 : index
    %21 = vector.load %arg10[%c0_27, %c0_28, %c0_29] : memref<1x1x8xf32, #tpu.memory_space<vmem>>, vector<1x1x8xf32>
    %22 = vector.shape_cast %21 : vector<1x1x8xf32> to vector<1x8xf32>
    %cst = arith.constant dense<0.000000e+00> : vector<8x8xf32>
    %23 = tpu.matmul %4, %10, %cst {dimension_numbers = #tpu.dot_dimension_numbers<[1], [0], [0], [1], [0, 0, 1, 1], [], []>} : vector<8x32xf32>, vector<32x8xf32>, vector<8x8xf32> -> vector<8x8xf32>
    %24 = vector.broadcast %18 : vector<1x8xf32> to vector<8x8xf32>
    %25 = arith.addf %23, %24 : vector<8x8xf32>
    %cst_30 = arith.constant dense<0.000000e+00> : vector<8x8xf32>
    %26 = tpu.matmul %6, %12, %cst_30 {dimension_numbers = #tpu.dot_dimension_numbers<[1], [0], [0], [1], [0, 0, 1, 1], [], []>} : vector<8x32xf32>, vector<32x8xf32>, vector<8x8xf32> -> vector<8x8xf32>
    %27 = vector.broadcast %20 : vector<1x8xf32> to vector<8x8xf32>
    %28 = arith.addf %26, %27 : vector<8x8xf32>
    %cst_31 = arith.constant dense<0.000000e+00> : vector<8x8xf32>
    %29 = tpu.matmul %8, %14, %cst_31 {dimension_numbers = #tpu.dot_dimension_numbers<[1], [0], [0], [1], [0, 0, 1, 1], [], []>} : vector<8x32xf32>, vector<32x8xf32>, vector<8x8xf32> -> vector<8x8xf32>
    %30 = vector.broadcast %22 : vector<1x8xf32> to vector<8x8xf32>
    %31 = arith.addf %29, %30 : vector<8x8xf32>
    %cst_32 = arith.constant dense<0.000000e+00> : vector<8x8xf32>
    %32 = tpu.matmul %25, %28, %cst_32 {dimension_numbers = #tpu.dot_dimension_numbers<[1], [1], [0], [0], [0, 0, 1, 0], [], []>} : vector<8x8xf32>, vector<8x8xf32>, vector<8x8xf32> -> vector<8x8xf32>
    %cst_33 = arith.constant dense<0xFF800000> : vector<8xf32>
    %33 = vector.multi_reduction <maximumf>, %32, %cst_33 [1] : vector<8x8xf32> to vector<8xf32>
    %34 = vector.shape_cast %33 : vector<8xf32> to vector<8x1xf32>
    %35 = vector.broadcast %34 : vector<8x1xf32> to vector<8x8xf32>
    %36 = arith.subf %32, %35 : vector<8x8xf32>
    %37 = math.exp %36 : vector<8x8xf32>
    %cst_34 = arith.constant dense<0.000000e+00> : vector<8xf32>
    %38 = vector.multi_reduction <add>, %37, %cst_34 [1] : vector<8x8xf32> to vector<8xf32>
    %39 = vector.shape_cast %38 : vector<8xf32> to vector<8x1xf32>
    %40 = tpu.reciprocal %39 : vector<8x1xf32> -> vector<8x1xf32>
    %41 = vector.broadcast %40 : vector<8x1xf32> to vector<8x8xf32>
    %42 = arith.mulf %37, %41 : vector<8x8xf32>
    %c0_35 = arith.constant 0 : index
    %c0_36 = arith.constant 0 : index
    %c0_37 = arith.constant 0 : index
    %c0_38 = arith.constant 0 : index
    %43 = vector.load %arg14[%c0_35, %c0_36, %c0_37, %c0_38] : memref<1x1x8x8xf32, #tpu.memory_space<vmem>>, vector<1x1x8x8xf32>
    %44 = vector.shape_cast %43 : vector<1x1x8x8xf32> to vector<8x8xf32>
    %45 = vector.shape_cast %42 : vector<8x8xf32> to vector<1x1x8x8xf32>
    tpu.vector_store %arg14[%c0_35, %c0_36, %c0_37, %c0_38], %45 {strides = array<i32>} : memref<1x1x8x8xf32, #tpu.memory_space<vmem>>, vector<1x1x8x8xf32>,
    %cst_39 = arith.constant dense<0.000000e+00> : vector<8x8xf32>
    %46 = tpu.matmul %42, %31, %cst_39 {dimension_numbers = #tpu.dot_dimension_numbers<[1], [0], [0], [1], [0, 0, 1, 1], [], []>} : vector<8x8xf32>, vector<8x8xf32>, vector<8x8xf32> -> vector<8x8xf32>
    %c0_40 = arith.constant 0 : index
    %c0_41 = arith.constant 0 : index
    %47 = vector.load %arg15[%c0_40, %c0_41] : memref<8x32xf32, #tpu.memory_space<vmem>>, vector<8x32xf32>
    %cst_42 = arith.constant dense<0.000000e+00> : vector<8x32xf32>
    %48 = tpu.matmul %46, %16, %cst_42 {dimension_numbers = #tpu.dot_dimension_numbers<[1], [0], [0], [1], [0, 0, 1, 1], [], []>} : vector<8x8xf32>, vector<8x32xf32>, vector<8x32xf32> -> vector<8x32xf32>
    %49 = arith.addf %47, %48 : vector<8x32xf32>
    %c0_43 = arith.constant 0 : index
    %c0_44 = arith.constant 0 : index
    %50 = vector.load %arg15[%c0_43, %c0_44] : memref<8x32xf32, #tpu.memory_space<vmem>>, vector<8x32xf32>
    tpu.vector_store %arg15[%c0_43, %c0_44], %49 {strides = array<i32>} : memref<8x32xf32, #tpu.memory_space<vmem>>, vector<8x32xf32>,
    %c3_i32 = arith.constant 3 : i32
    %51 = arith.cmpi eq, %arg1, %c3_i32 : i32
    %52 = arith.extui %51 : i1 to i32
    %c0_i32_45 = arith.constant 0 : i32
    %53 = arith.cmpi ne, %52, %c0_i32_45 : i32
    scf.if %53 {
      %c0_46 = arith.constant 0 : index
      %c0_47 = arith.constant 0 : index
      %54 = vector.load %arg15[%c0_46, %c0_47] : memref<8x32xf32, #tpu.memory_space<vmem>>, vector<8x32xf32>
      %c0_48 = arith.constant 0 : index
      %c0_49 = arith.constant 0 : index
      %c0_50 = arith.constant 0 : index
      %55 = vector.load %arg13[%c0_48, %c0_49, %c0_50] : memref<1x8x32xf32, #tpu.memory_space<vmem>>, vector<1x8x32xf32>
      %56 = vector.shape_cast %55 : vector<1x8x32xf32> to vector<8x32xf32>
      %57 = vector.shape_cast %54 : vector<8x32xf32> to vector<1x8x32xf32>
      tpu.vector_store %arg13[%c0_48, %c0_49, %c0_50], %57 {strides = array<i32>} : memref<1x8x32xf32, #tpu.memory_space<vmem>>, vector<1x8x32xf32>,
    } else {
    }
    return
  }
  func.func @transform_0(%arg0: i32, %arg1: i32) -> (i32, i32, i32) {
    %c0_i32 = arith.constant 0 : i32
    %c0_i32_0 = arith.constant 0 : i32
    %c0_i32_1 = arith.constant 0 : i32
    return %arg0, %c0_i32, %c0_i32_0 : i32, i32, i32
  }
  func.func @transform_1(%arg0: i32, %arg1: i32) -> (i32, i32, i32) {
    %c0_i32 = arith.constant 0 : i32
    %c0_i32_0 = arith.constant 0 : i32
    %c0_i32_1 = arith.constant 0 : i32
    return %arg0, %c0_i32, %c0_i32_0 : i32, i32, i32
  }
  func.func @transform_2(%arg0: i32, %arg1: i32) -> (i32, i32, i32) {
    %c0_i32 = arith.constant 0 : i32
    %c0_i32_0 = arith.constant 0 : i32
    %c0_i32_1 = arith.constant 0 : i32
    return %arg0, %c0_i32, %c0_i32_0 : i32, i32, i32
  }
  func.func @transform_3(%arg0: i32, %arg1: i32) -> (i32, i32, i32) {
    %c0_i32 = arith.constant 0 : i32
    %c0_i32_0 = arith.constant 0 : i32
    %c0_i32_1 = arith.constant 0 : i32
    return %arg1, %c0_i32, %c0_i32_0 : i32, i32, i32
  }
  func.func @transform_4(%arg0: i32, %arg1: i32) -> (i32, i32, i32) {
    %c0_i32 = arith.constant 0 : i32
    %c0_i32_0 = arith.constant 0 : i32
    %c0_i32_1 = arith.constant 0 : i32
    return %arg1, %c0_i32, %c0_i32_0 : i32, i32, i32
  }
  func.func @transform_5(%arg0: i32, %arg1: i32) -> (i32, i32, i32) {
    %c0_i32 = arith.constant 0 : i32
    %c0_i32_0 = arith.constant 0 : i32
    %c0_i32_1 = arith.constant 0 : i32
    return %arg1, %c0_i32, %c0_i32_0 : i32, i32, i32
  }
  func.func @transform_6(%arg0: i32, %arg1: i32) -> (i32, i32, i32) {
    %c0_i32 = arith.constant 0 : i32
    %c0_i32_0 = arith.constant 0 : i32
    %c0_i32_1 = arith.constant 0 : i32
    return %arg1, %c0_i32, %c0_i32_0 : i32, i32, i32
  }
  func.func @transform_7(%arg0: i32, %arg1: i32) -> (i32, i32, i32) {
    %c0_i32 = arith.constant 0 : i32
    %c0_i32_0 = arith.constant 0 : i32
    %c0_i32_1 = arith.constant 0 : i32
    return %arg1, %c0_i32, %c0_i32_0 : i32, i32, i32
  }
  func.func @transform_8(%arg0: i32, %arg1: i32) -> (i32, i32, i32) {
    %c0_i32 = arith.constant 0 : i32
    %c0_i32_0 = arith.constant 0 : i32
    %c0_i32_1 = arith.constant 0 : i32
    return %arg1, %c0_i32, %c0_i32_0 : i32, i32, i32
  }
  func.func @transform_9(%arg0: i32, %arg1: i32) -> (i32, i32, i32) {
    %c0_i32 = arith.constant 0 : i32
    %c0_i32_0 = arith.constant 0 : i32
    %c0_i32_1 = arith.constant 0 : i32
    return %arg1, %c0_i32, %c0_i32_0 : i32, i32, i32
  }
  func.func @transform_10(%arg0: i32, %arg1: i32) -> (i32, i32) {
    %c0_i32 = arith.constant 0 : i32
    %c0_i32_0 = arith.constant 0 : i32
    %c0_i32_1 = arith.constant 0 : i32
    return %c0_i32, %c0_i32_0 : i32, i32
  }
  func.func @transform_11(%arg0: i32, %arg1: i32) -> (i32, i32, i32) {
    %c0_i32 = arith.constant 0 : i32
    %c0_i32_0 = arith.constant 0 : i32
    %c0_i32_1 = arith.constant 0 : i32
    return %arg0, %c0_i32, %c0_i32_0 : i32, i32, i32
  }
  func.func @transform_12(%arg0: i32, %arg1: i32) -> (i32, i32, i32, i32) {
    %c0_i32 = arith.constant 0 : i32
    %c0_i32_0 = arith.constant 0 : i32
    %c0_i32_1 = arith.constant 0 : i32
    return %arg0, %arg1, %c0_i32, %c0_i32_0 : i32, i32, i32, i32
  }
}

</mosaic_0001>

<bundles_post_ra>
// kernel: tpu_custom_call.1
= control target key start
LH: loop header
LB: loop body
LE: loop exit
PB: predicated region body
PF: predicated region fallthrough
CT: control target
= control target key end

     0   :  { %s2136_s0 = inlined_call_operand.vmem [shape: f32[2,8,32], index: 0, kind: input, shape index: {}]   ;;  %s2137_s1 = inlined_call_operand.vmem [shape: f32[2,8,32], index: 1, kind: input, shape index: {}]   ;;  %s2138_s2 = inlined_call_operand.vmem [shape: f32[2,8,32], index: 2, kind: input, shape index: {}]   ;;  %s2139_s3 = inlined_call_operand.vmem [shape: f32[4,32,8], index: 3, kind: input, shape index: {}]   ;;  %s2140_s4 = inlined_call_operand.vmem [shape: f32[4,1,8], index: 4, kind: input, shape index: {}]   ;;  %s2141_s5 = inlined_call_operand.vmem [shape: f32[4,32,8], index: 5, kind: input, shape index: {}]   ;;  %s2142_s6 = inlined_call_operand.vmem [shape: f32[4,1,8], index: 6, kind: input, shape index: {}]   ;;  %s2143_s7 = inlined_call_operand.vmem [shape: f32[4,32,8], index: 7, kind: input, shape index: {}]   ;;  %s2144_s8 = inlined_call_operand.vmem [shape: f32[4,1,8], index: 8, kind: input, shape index: {}]   ;;  %s2145_s9 = inlined_call_operand.vmem [shape: f32[4,8,32], index: 9, kind: input, shape index: {}]   ;;  %s2146_s10 = inlined_call_operand.vmem [shape: f32[1,32], index: 10, kind: input, shape index: {}]   ;;  %s2147_s11 = inlined_call_operand.hbm [shape: f32[2,8,32], index: 11, kind: output, shape index: {0}]   ;;  %s2148_s12 = inlined_call_operand.hbm [shape: f32[2,4,8,8], index: 12, kind: output, shape index: {1}]  }
   0x1   :  { %2173 = sst [smem:[#allocation27_spill]] %s2138_s2 }
   0x2   :  { %2174 = sst [smem:[#allocation28_spill]] %s2139_s3 }
   0x3   :  { %2175 = sst [smem:[#allocation29_spill]] %s2145_s9 }
   0x4   :  { %2176 = sst [smem:[#allocation30_spill]] %s2146_s10 }
   0x5   :  { %2177 = sst [smem:[#allocation31_spill]] %s2147_s11 }
   0x6   :  { %2178 = sst [smem:[#allocation32_spill]] %s2148_s12 }
   0x7   :  { %18 = vsyncpa [#allocation4], 0 }
   0x8   :  { %20 = vsyncpa [#allocation4 + $0x1], 0 }
   0x9   :  { %21 = vsyncpa [#allocation6], 0 }
   0xa   :  { %23 = vsyncpa [#allocation6 + $0x1], 0  ;;  %s1794_s21 = smov 0   ;;  %s1796_s22 = smov 0  }
   0xb   :  { %s1798_s23 = smov 0   ;;  %s1800_s24 = smov 0  }
   0xc   :  { %s1802_s25 = smov 0   ;;  %s1804_s26 = smov 0  }
   0xd   :  { %s1806_s27 = smov 0   ;;  %s1808_s28 = smov 0  }
   0xe   :  { %s1810_s29 = smov 0   ;;  %s1812_s30 = smov 0  }
   0xf   :  { %s1814_s13 = smov 0  }
  0x10 LB: > { %2179 = sst [smem:[#allocation9_spill]] %s1682_s21  ;;  %s1338_s14 = sadd.s32 4294967295, %s1722_s13   ;;  %s1722_s13 = sphi %s1814_s13, %s29_s13   ;;  %s1718_s30 = sphi %s1812_s30, %s2236_s30   ;;  %s1714_s29 = sphi %s1810_s29, %s2235_s29   ;;  %s1710_s28 = sphi %s1808_s28, %s2234_s28   ;;  %s1706_s27 = sphi %s1806_s27, %s2233_s27   ;;  %s1702_s26 = sphi %s1804_s26, %s2232_s26   ;;  %s1698_s25 = sphi %s1802_s25, %s2231_s25   ;;  %s1694_s24 = sphi %s1800_s24, %s2230_s24   ;;  %s1690_s23 = sphi %s1798_s23, %s2229_s23   ;;  %s1686_s22 = sphi %s1796_s22, %s2228_s22   ;;  %s1682_s21 = sphi %s1794_s21, %s2227_s21  }
  0x11   : > { %2180 = sst [smem:[#allocation10_spill]] %s1686_s22  ;;  %s1339_s15 = sadd.s32 4294967294, %s1722_s13  }
  0x12   : > { %2181 = sst [smem:[#allocation11_spill]] %s1690_s23  ;;  %s38_s16 = sadd.s32 1, %s1714_s29 }
  0x13   : > { %2182 = sst [smem:[#allocation12_spill]] %s1694_s24  ;;  %s41_s17 = sadd.s32 1, %s1718_s30 }
  0x14   : > { %2183 = sst [smem:[#allocation13_spill]] %s1698_s25  ;;  %p39_p0 = scmp.ge.s32.totalorder %s38_s16, 4 }
  0x15   : > { %2184 = sst [smem:[#allocation14_spill]] %s1702_s26  ;;  %s329_s18 = sadd.s32 1, %s1702_s26 }
  0x16   : > { %2185 = sst [smem:[#allocation15_spill]] %s1710_s28  ;;  %p339_p1 = scmp.ne.s32.totalorder %s1702_s26, %s1698_s25 }
  0x17   : > { %2186 = sst [smem:[#allocation16_spill]] %s1714_s29  ;;  %p1856_p2 = scmp.eq.s32.totalorder %s1338_s14, 7 }
  0x18   : > { %2187 = sst [smem:[#allocation17_spill]] %s1718_s30  ;;  %s2238_s16 = smov (%p39_p0, %s38_s16), 0 }
  0x19   : > { %2188 = sst [smem:[#allocation18_spill]] %s1722_s13  ;;  %s2240_s17 = smov (!%p39_p0, %s41_s17), %s1718_s30 }
  0x1a   : > { %2190 = sst [smem:[#allocation19_spill]] %s2238_s16  ;;  %p1865_p3 = por %p1856_p2, %p339_p1 }
  0x1b   : > { %p345_p4 = scmp.ne.s32.totalorder %s1698_s25, %s1694_s24  ;;  %p43_p5 = scmp.ge.s32.totalorder %s2240_s17, 2 }
  0x1c   : > { %s2191_s20 = scalar_select %p1865_p3, 1, 0 }
  0x1d   : > { %p1871_p6 = scmp.eq.s32.totalorder %s1339_s15, 7  ;;  %s353_s12 = ssub.s32 %s1714_s29, %s2238_s16 }
  0x1e   : > { %2192 = sst [smem:[#allocation20_spill]] %s2191_s20  ;;  %s357_s11 = sadd.s32 1, %s1690_s23 }
  0x1f   : > { %s2242_s17 = smov (%p43_p5, %s2240_s17), 0  ;;  %p1882_p7 = por %p1871_p6, %p345_p4 }
  0x20   : > { %2194 = sst [smem:[#allocation21_spill]] %s2242_s17  ;;  %p367_p8 = scmp.ne.s32.totalorder %s1690_s23, %s1686_s22 }
  0x21   : > { %s2195_s10 = scalar_select %p1882_p7, 1, 0 }
  0x22   : > { %s326_s24 = ssub.s32 %s1718_s30, %s2242_s17  ;;  %p373_p9 = scmp.ne.s32.totalorder %s1686_s22, %s1682_s21 }
  0x23   : > { %2196 = sst [smem:[#allocation22_spill]] %s2195_s10  ;;  %p327_p10 = scmp.eq.s32.totalorder %s326_s24, 0 }
  0x24   : > { %s354_s15 = sor.u32 %s353_s12, %s326_s24  ;;  %p1894_p12 = por %p367_p8, %p1856_p2 }
  0x25   : > { %p355_p11 = scmp.eq.s32.totalorder %s354_s15, 0  ;;  %p1906_p13 = por %p373_p9, %p1871_p6 }
  0x26   : > { %s2197_s20 = scalar_select %p1894_p12, 1, 0 }
  0x27   : > { %s1899_s16 = scalar_select %p327_p10, %s1702_s26, %s329_s18  }
  0x28   : > { %2198 = sst [smem:[#allocation23_spill]] %s2197_s20  ;;  %p1342_p0 = scmp.ge.s32.totalorder %s1722_s13, 1 }
  0x29   : > { %2199 = sst [smem:[#allocation24_spill]] %s1899_s16  ;;  %p465_p1 = scmp.lt.s32.totalorder %s1722_s13, 9 }
  0x2a   : > { %s1902_s29 = scalar_select %p355_p11, %s1690_s23, %s357_s11  }
  0x2b   : > { %s2201_s9 = scalar_select %p1906_p13, 1, 0 }
  0x2c   : > { %2200 = sst [smem:[#allocation25_spill]] %s1902_s29  ;;  %p466_p4 = pnand %p1342_p0, %p465_p1 }
  0x2d   : > { %2202 = sst [smem:[#allocation26_spill]] %s2201_s9  ;;  %s2156_s12 = sand.u32 (!%p466_p4), 1, %s1698_s25  }
  0x2e   : > { %469 = sbr.rel (%p466_p4) target bundleno = 1306 (0x51a), region = 64  ;;  %s2158_s11 = sand.u32 (!%p466_p4), 1, %s1686_s22  }
  0x2f   : > { %s1916_s24 = sshll.u32 (!%p466_p4), %s2156_s12, 3  ;;  %s1920_s18 = sshll.u32 (!%p466_p4), %s2158_s11, 3 }
  0x30   : > { %p547_p2 = scmp.lt.s32.totalorder (!%p466_p4), %s1710_s28, 1  ;;  %p559_p5 = scmp.lt.s32.totalorder (!%p466_p4), %s1706_s27, 3 }
  0x31   : > { %s2204_s3 = sld [smem:[#allocation28_spill]] (!%p466_p4)  ;;  %s2205_s17 = sld [smem:[#allocation29_spill]] (!%p466_p4) }
  0x32   : > { %s539_s11 = scalar_lea.vmem (!%p466_p4), [#allocation3], %s1916_s24  ;;  %s546_s12 = scalar_lea.vmem (!%p466_p4), [#allocation5], %s1920_s18 }
  0x33   : > { %p1355_p6 = scmp.ne.s32.totalorder (!%p466_p4), %s1706_s27, 0 }
  0x35   : > { %s548_s19 = scalar_select %p547_p2, %s1710_s28, 1 }
  0x36   : > { %s1926_s14 = scalar_select %p559_p5, %s1706_s27, 3 }
  0x37   : > { %s1928_s15 = sshll.u32 %s548_s19, 3  ;;  %590 = sbr.rel (%p1355_p6) target bundleno = 67 (0x43), region = 68  ;;  %vm598_vm0 = vcmask (!%p1355_p6), 261120  }
  0x38   : > { %s1375_s21 = sshll.u32 %s1926_s14, 5  ;;  %s574_s26 = scalar_lea.vmem %s2142_s6, %s1926_s14 }
  0x39   : > { %s1946_s19 = scalar_lea.vmem %s2204_s3, %s1375_s21  ;;  %s571_s25 = scalar_lea.vmem %s2141_s5, %s1375_s21 }
  0x3a   : > { %s1962_s9 = scalar_lea.vmem %s2143_s7, %s1375_s21  ;;  %s582_s3 = scalar_lea.vmem %s2144_s8, %s1926_s14 }
  0x3b   : > { %s1354_s28 = sshll.u32 %s1926_s14, 3  ;;  %s2206_s23 = sld [smem:[#allocation30_spill]] (!%p1355_p6) }
  0x3c   : > { %s1972_s2 = scalar_lea.vmem %s2205_s17, %s1354_s28 }
  0x41   : > { %v1356_v0 = vld [vmem:[%s2206_s23] ss:$0 sm:$0xff] }
  0x42   : > { %599 = vst.msk [vmem:[#allocation2] sm:$0xff] %vm598_vm0, %v1356_v0 }
  0x43 PF: > { %v607_v1 = vld [vmem:[%s571_s25] sm:$0xff]  ;;  %v608_v2 = vld [vmem:[%s571_s25 + $0x8] sm:$0xff]  ;;  %v1724_v4 = vmov 0.0|0.0   ;;  %v609_v7 = vld [vmem:[%s571_s25 + $0x10] sm:$0xff]  ;;  %vm1725_vm1 = vmmov 0   ;;  %v1726_v10 = vmov 0.0   ;;  %s2207_s28 = scalar_lea.vmem %s2137_s1, %s1928_s15  ;;  %s2208_s29 = scalar_lea.vmem %s2136_s0, %s1928_s15 }
  0x44   : > { %v603_v3 = vld [vmem:[%s1946_s19] sm:$0xff]  ;;  %1453 = vmatprep.subr.bf16.mxu1 %v1724_v4  ;;  %v1454_v5 = vpack.c.bf16 %v608_v2, %v607_v1  ;;  %1447 = vmatprep.subr.bf16.mxu0 %v1724_v4  ;;  %v604_v6 = vld [vmem:[%s1946_s19 + $0x8] sm:$0xff]  ;;  %v610_v8 = vld [vmem:[%s571_s25 + $0x18] sm:$0xff]  ;;  %vm625_vm2 = vcmask 261120   ;;  %s2209_s30 = scalar_lea.vmem %s2140_s4, %s1926_s14  ;;  %vm857_vm3 = vcmask 64512   ;;  %s2210_s23 = sld [smem:[#allocation27_spill]] }
  0x45   : > { %v1448_v9 = vpack.c.bf16 %v604_v6, %v603_v3  ;;  %1418 = vmatprep.mubr.msk.f32.mxu1 %vm1725_vm1, %v1726_v10  ;;  %v605_v11 = vld [vmem:[%s1946_s19 + $0x10] sm:$0xff]  ;;  %v606_v12 = vld [vmem:[%s1946_s19 + $0x18] sm:$0xff]  ;;  %1407 = vmatprep.mubr.msk.f32.mxu0 %vm1725_vm1, %v1726_v10  ;;  %v1457_v13 = vpack.c.bf16 %v610_v8, %v609_v7  ;;  %v601_v15 = vld [vmem:[%s2207_s28] sm:$0xff]  ;;  %p1367_p8 = scmp.ne.s32.totalorder %s1706_s27, 3 }
  0x46   : > { %1455 = vmatpush3.bf16.msra.mxu1 %v1454_v5  ;;  %v1451_v14 = vpack.c.bf16 %v606_v12, %v605_v11  ;;  %v600_v16 = vld [vmem:[%s2208_s29] sm:$0xff]  ;;  %v612_v26 = vld [vmem:[%s1962_s9 + $0x8] sm:$0xff]  ;;  %v613_v27 = vld [vmem:[%s1962_s9 + $0x10] sm:$0xff] }
  0x47   : > { %1449 = vmatpush3.bf16.msra.mxu0 %v1448_v9  ;;  %1456 = vmatprep.subr.bf16.mxu1 %v1724_v4  ;;  %v1359_v17 = vld [vmem:[%s574_s26] ss:$0 sm:$0xff]  ;;  %v614_v29 = vld [vmem:[%s1962_s9 + $0x18] sm:$0xff] }
  0x48   : > { %1450 = vmatprep.subr.bf16.mxu0 %v1724_v4  ;;  %v1357_v18 = vld [vmem:[%s2209_s30] ss:$0 sm:$0xff]  ;;  %v1463_v30 = vpack.c.bf16 %v614_v29, %v613_v27 }
  0x49   : > { %v611_v25 = vld [vmem:[%s1962_s9] sm:$0xff] }
  0x4a   : > { %1458 = vmatpush3.bf16.msra.mxu1 %v1457_v13  ;;  %v1460_v28 = vpack.c.bf16 %v612_v26, %v611_v25  ;;  %s2211_s21 = scalar_lea.vmem %s2210_s23, %s1928_s15  ;;  %v1361_v41 = vld [vmem:[%s582_s3] ss:$0 sm:$0xff] }
  0x4b   : > { %1452 = vmatpush3.bf16.msra.mxu0 %v1451_v14  ;;  %1432 = vmatprep.subr.mxu1 %v1726_v10  ;;  %v602_v31 = vld [vmem:[%s2211_s21] sm:$0xff] }
  0x4c   : > { %1459 = vmatprep.subr.bf16.mxu0 %v1724_v4  ;;  %v615_v44 = vld [vmem:[%s1972_s2] sm:$0xff] }
  0x4d   : > { %1419 = vmatmul.mubr.msk.f32.vlgmr.msra.gmra.mrb[0].mxu1 %vm625_vm2, %v601_v15  ;;  %v1019_v50 = vld [vmem:[#allocation2] sm:$0xff] }
  0x4e   : > { %1408 = vmatmul.mubr.msk.f32.vlgmr.msra.gmra.mrb[0].mxu0 %vm625_vm2, %v600_v16  ;;  %1434 = vmatprep.mubr.msk.f32.mxu1 %vm1725_vm1, %v1726_v10 }
  0x4f   : > { %1429 = vmatprep.mubr.msk.f32.mxu0 %vm1725_vm1, %v1726_v10  ;;  %1461 = vmatpush3.bf16.msra.mxu0 %v1460_v28 }
  0x50   : > { %1462 = vmatprep.subr.bf16.mxu0 %v1724_v4 }
  0x53   : > { %1464 = vmatpush3.bf16.msra.mxu0 %v1463_v30 }
  0x54   : > { %1442 = vmatprep.subr.mxu0 %v1726_v10 }
  0x56   : > { %1430 = vmatmul.mubr.msk.f32.vlgmr.msra.gmra.mrb[2].mxu0 %vm625_vm2, %v602_v31 }
  0x57   : > { %1444 = vmatprep.mubr.msk.f32.mxu0 %vm1725_vm1, %v1726_v10  ;;  %1443 = vmatpush3.msra.mxu0 %v615_v44 }
 0x120   : > { %v774_v19 = vpop.f32.mrb[0].mxu1 }
 0x121   : > { %v775_v20 = vadd.f32 %v1359_v17, %v774_v19  ;;  %v1420_v21 = vpop.f32.mrb[1].mxu1  ;;  %v695_v22 = vpop.f32.mrb[0].mxu0 }
 0x122   : > { %v696_v23 = vadd.f32 %v1357_v18, %v695_v22  ;;  %v1409_v24 = vpop.f32.mrb[1].mxu0 }
 0x123   : > { %1433 = vmatpush3.xpose.msk.msra.mxu1 %vm857_vm3, %v775_v20 }
 0x124   : > { %1437 = vmatprep.subr.mxu1 %v1726_v10 }
 0x126   : > { %1435 = vmatmul.mubr.msk.f32.vlgmr.msra.gmra.mrb[2].mxu1 %vm857_vm3, %v696_v23 }
 0x127   : > { %1439 = vmatprep.mubr.msk.f32.mxu1 %vm1725_vm1, %v1726_v10 }
 0x129   : > { %v853_v40 = vpop.f32.mrb[2].mxu0 }
 0x12a   : > { %v1431_v42 = vpop.f32.mrb[3].mxu0  ;;  %v854_v43 = vadd.f32 %v1361_v41, %v853_v40 }
 0x12c   : > { %1438 = vmatpush3.msra.mxu1 %v854_v43 }
 0x1f9   : > { %v930_v32 = vpop.f32.mrb[2].mxu1 }
 0x1fa   : > { %v1436_v33 = vpop.f32.mrb[3].mxu1  ;;  %v934_v34 = vsel %vm857_vm3, %v930_v32, -inf }
 0x1fb   : > { %935 = vmax.xlane.f32.xlu0 %v934_v34 }
 0x288   : > { %v936_v35 = vpop.xlane.xlu0 %935 }
 0x289   : > { %v937_v36 = vsub.f32 %v930_v32, %v936_v35 }
 0x28b   : > { %v938_v37 = vmul.f32 1.442695, %v937_v36 }
 0x28d   : > { %1568 = vpow2.f32 %v938_v37 }
 0x297   : > { %v1569_v38 = vpop.eup %1568 }
 0x298   : > { %v940_v39 = vsel %vm857_vm3, %v1569_v38, 0.0 }
 0x299   : > { %941 = vadd.xlane.f32.xlu0 %v940_v39 }
 0x326   : > { %v942_v45 = vpop.xlane.xlu0 %941 }
 0x327   : > { %1570 = vrcp.f32 %v942_v45 }
 0x331   : > { %v1571_v46 = vpop.eup %1570 }
 0x332   : > { %v944_v47 = vmul.f32 %v1571_v46, %v1569_v38 }
 0x334   : > { %945 = vst.msk [vmem:[%s546_s12] sm:$0xff] %vm857_vm3, %v944_v47  ;;  %1440 = vmatmul.mubr.msk.f32.vlgmr.msra.gmra.mrb[4].mxu1 %vm857_vm3, %v944_v47 }
 0x407   : > { %v1015_v48 = vpop.f32.mrb[4].mxu1 }
 0x408   : > { %v1441_v49 = vpop.f32.mrb[5].mxu1  ;;  %1445 = vmatmul.mubr.msk.f32.vlgmr.msra.gmra.mrb[4].mxu0 %vm857_vm3, %v1015_v48 }
 0x4d8   : > { %1098 = sbr.rel (%p1367_p8) target bundleno = 1255 (0x4e7), region = 72 }
 0x4db   : > { %v1089_v51 = vpop.f32.mrb[4].mxu0 }
 0x4dc   : > { %v1093_v52 = vadd.f32 %v1089_v51, %v1019_v50  ;;  %v1446_v53 = vpop.f32.mrb[5].mxu0 }
 0x4de   : > { %1094 = vst.msk [vmem:[#allocation2] sm:$0xff] %vm625_vm2, %v1093_v52 }
 0x4e5   : > { %v1099_v54 = vld [vmem:[#allocation2] sm:$0xff] }
 0x4e6   : > { %1100 = vst.msk [vmem:[%s539_s11] sm:$0xff] %vm625_vm2, %v1099_v54 }
 0x4e7 PF: > { %s2212_s2 = sld [smem:[#allocation15_spill]]  ;;  %s2213_s3 = sld [smem:[#allocation13_spill]] }
 0x4e8   : > { %s2215_s19 = sld [smem:[#allocation31_spill]]  ;;  %s1120_s10 = sshll.u32 %s539_s11, 4  ;;  %s1121_s10 = int_to_ptr.vmem [resolvable:$true] %s1120_s10 }
 0x4e9   : > { %s1572_s20 = scalar_lea.vmem %s1121_s10, 128  ;;  %s1727_s30 = smov [#allocation3]  }
 0x4ea   : > { %p1573_p9 = scmp.ne.s32.totalorder %s1121_s10, %s1572_s20  ;;  %s1576_s26 = sshll.u32 %s1727_s30, 4  ;;  %s1577_s26 = int_to_ptr.vmem [resolvable:$false] %s1576_s26 }
 0x4eb   : > { %s1578_s16 = scalar_lea.vmem %s1577_s26, 256  ;;  %p1579_p0 = scmp.lt.s32.totalorder %s1121_s10, %s1577_s26 }
 0x4ec   : > { %p1574_p10 = pnand %p1573_p9, %p1865_p3  ;;  %p1580_p1 = scmp.lt.s32.totalorder %s1578_s16, %s1572_s20 }
 0x4ed   : > { %s1370_s25 = sshll.u32 %s2212_s2, 7  ;;  %s2216_s13 = sand.u32 1, %s2213_s3  }
 0x4ee   : > { %s2046_s29 = scalar_lea.hbm %s2215_s19, %s1370_s25  ;;  %s1102_s22 = scalar_lea.sflag [#allocation4], %s2216_s13 }
 0x4ef   : > { %p1575_p11 = pneg %p1574_p10  ;;  %p1581_p4 = por %p1580_p1, %p1579_p0 }
 0x4f1   : > { %p1582_p2 = pnand %p1581_p4, %p1575_p11 }
 0x4f3   : > { %1585 = shalt.err (!%p1582_p2)
}
 0x4f4   : > { %s1586_s24 = scalar_lea.hbm %s2046_s29, 128  ;;  %s1590_s21 = scalar_lea.hbm %s2215_s19, 256 }
 0x4f5   : > { %p1587_p5 = scmp.ne.s32.totalorder %s2046_s29, %s1586_s24  ;;  %p1591_p9 = scmp.lt.u32.totalorder %s2046_s29, %s2215_s19 }
 0x4f6   : > { %p1592_p10 = scmp.lt.u32.totalorder %s1590_s21, %s1586_s24  ;;  %p1594_p0 = scmp.lt.u32.totalorder %s1586_s24, %s2046_s29 }
 0x4f7   : > { %p1588_p6 = pnand %p1587_p5, %p1865_p3 }
 0x4f8   : > { %p1593_p11 = por %p1592_p10, %p1591_p9 }
 0x4f9   : > { %p1589_p8 = pneg %p1588_p6 }
 0x4fa   : > { %p1595_p1 = por %p1594_p0, %p1593_p11 }
 0x4fc   : > { %p1596_p4 = pnand %p1595_p1, %p1589_p8 }
 0x4fe   : > { %1599 = shalt.err (!%p1596_p4)
}
 0x4ff   : > { %s2217_s3 = sld [smem:[#allocation10_spill]]  ;;  %s1371_s28 = sshll.u32 %s2212_s2, 2 }
 0x500   : > { %1465 = dma.vmem_to_hbm [thread:$0]  (%p1865_p3), %s1121_s10, 128, %s2046_s29, %s1102_s22  }
 0x501   : > { %s1135_s17 = sshll.u32 %s546_s12, 4  ;;  %s1131_s13 = sadd.s32 %s1706_s27, %s1371_s28  ;;  %s2073_s17 = int_to_ptr.vmem [resolvable:$true] %s1135_s17 }
 0x502   : > { %s1372_s20 = sshll.u32 %s1131_s13, 7  ;;  %s2219_s14 = sld [smem:[#allocation32_spill]] }
 0x503   : > { %s1600_s23 = scalar_lea.vmem %s2073_s17, 128  ;;  %s1728_s18 = smov [#allocation5]  }
 0x504   : > { %p1601_p2 = scmp.ne.s32.totalorder %s2073_s17, %s1600_s23  ;;  %s1604_s12 = sshll.u32 %s1728_s18, 4  ;;  %s1605_s12 = int_to_ptr.vmem [resolvable:$false] %s1604_s12 }
 0x505   : > { %s2220_s24 = sand.u32 1, %s2217_s3   ;;  %s1606_s27 = scalar_lea.vmem %s1605_s12, 256 }
 0x506   : > { %s1107_s11 = scalar_lea.sflag [#allocation6], %s2220_s24  ;;  %p1602_p3 = pnand %p1601_p2, %p1894_p12 }
 0x507   : > { %p1607_p6 = scmp.lt.s32.totalorder %s2073_s17, %s1605_s12  ;;  %p1608_p8 = scmp.lt.s32.totalorder %s1606_s27, %s1600_s23 }
 0x508   : > { %s1133_s16 = scalar_lea.hbm %s2219_s14, %s1372_s20  ;;  %p1603_p5 = pneg %p1602_p3 }
 0x509   : > { %p1609_p9 = por %p1608_p8, %p1607_p6 }
 0x50b   : > { %p1610_p10 = pnand %p1609_p9, %p1603_p5 }
 0x50d   : > { %1613 = shalt.err (!%p1610_p10)
}
 0x50e   : > { %s1614_s2 = scalar_lea.hbm %s1133_s16, 128  ;;  %s1618_s22 = scalar_lea.hbm %s2219_s14, 1024 }
 0x50f   : > { %p1615_p11 = scmp.ne.s32.totalorder %s1133_s16, %s1614_s2  ;;  %p1619_p4 = scmp.lt.u32.totalorder %s1133_s16, %s2219_s14 }
 0x510   : > { %p1620_p2 = scmp.lt.u32.totalorder %s1618_s22, %s1614_s2  ;;  %p1622_p13 = scmp.lt.u32.totalorder %s1614_s2, %s1133_s16 }
 0x511   : > { %p1616_p0 = pnand %p1615_p11, %p1894_p12 }
 0x512   : > { %p1621_p3 = por %p1620_p2, %p1619_p4 }
 0x513   : > { %p1617_p1 = pneg %p1616_p0 }
 0x514   : > { %p1623_p6 = por %p1622_p13, %p1621_p3 }
 0x516   : > { %p1624_p5 = pnand %p1623_p6, %p1617_p1 }
 0x518   : > { %1627 = shalt.err (!%p1624_p5)
}
 0x519   : > { %1466 = dma.vmem_to_hbm [thread:$0]  (%p1894_p12), %s2073_s17, 128, %s1133_s16, %s1107_s11  }
 0x51a PF: > { %s2221_s15 = sld [smem:[#allocation18_spill]]  ;;  %s2222_s3 = sld [smem:[#allocation12_spill]] }
 0x520   : > { %p1476_p8 = scmp.ge.s32.totalorder %s2221_s15, 2  ;;  %s1147_s13 = sand.u32 1, %s2222_s3  }
 0x521   : > { %s1148_s20 = scalar_lea.sflag [#allocation4], %s1147_s13 }
 0x522   : > { %p1470_p9 = pnand %p1476_p8, %p1882_p7 }
 0x524   : > { %1673 = dma.done.wait (!%p1470_p9), %s1148_s20, 128  }
 0x525   : > { %1675 = vsyncadd (!%p1470_p9), %s1148_s20, 4294967168  ;;  %s2224_s30 = sld [smem:[#allocation9_spill]]  ;;  %s2225_s26 = sld [smem:[#allocation26_spill]] }
 0x52b   : > { %s1156_s24 = sand.u32 1, %s2224_s30   ;;  %p2226_p13 = scmp.ne.s32.totalorder %s2225_s26, 0 }
 0x52c   : > { %s1157_s23 = scalar_lea.sflag [#allocation6], %s1156_s24 }
 0x52d   : > { %p1473_p10 = pnand %p1476_p8, %p2226_p13 }
 0x52f   : > { %1677 = dma.done.wait (!%p1473_p10), %s1157_s23, 128  }
 0x530   : > { %1679 = vsyncadd (!%p1473_p10), %s1157_s23, 4294967168  ;;  %s29_s13 = sadd.s32 1, %s2221_s15   ;;  %s2227_s21 = sld [smem:[#allocation10_spill]] }
 0x531   : > { %p26_p12 = scmp.ge.s32.totalorder %s29_s13, 10   ;;  %s2228_s22 = sld [smem:[#allocation11_spill]] }
 0x532   : > { %s2229_s23 = sld [smem:[#allocation25_spill]]  ;;  %s2230_s24 = sld [smem:[#allocation13_spill]] }
 0x533   : > { %s2231_s25 = sld [smem:[#allocation14_spill]]  ;;  %s2232_s26 = sld [smem:[#allocation24_spill]] }
 0x534   : > { %s2233_s27 = sld [smem:[#allocation16_spill]]  ;;  %s2234_s28 = sld [smem:[#allocation17_spill]] }
 0x535   : > { %s2235_s29 = sld [smem:[#allocation19_spill]]  ;;  %s2236_s30 = sld [smem:[#allocation21_spill]] }
 0x536   :  { %28 = sbr.rel (!%p26_p12) target bundleno = 16 (0x10), region = 151 }
 0x53d   :  { %1162 = vsyncpa [#allocation4], 1 }
 0x53e   :  { %1164 = vsyncpa [#allocation4 + $0x1], 1 }
 0x53f   :  { %1165 = vsyncpa [#allocation6], 1 }
 0x540   :  { %1167 = vsyncpa [#allocation6 + $0x1], 1 }

</bundles_post_ra>
